<compile_context>
chip_gen: v5e
topology: v5e:2x2
jax: 0.10.0
libtpu: 0.0.40
codegen_flags: <defaults>
</compile_context>

<pallas_src>
import functools
import math

import jax
import jax.numpy as jnp
from jax.experimental import pallas as pl
from jax.experimental.pallas import tpu as pltpu


LANE = 128
SUBLANE = 8
TILE_ROWS = 1024        # streamed rows per grid step (f32 feat block = 512 KiB)
MAX_VMEM = 48 << 20     # scoped-VMEM cap: headroom under v7x's 64 MiB per-TC


def _cdiv(a, b):
    return -(-a // b)


def _round_up(a, b):
    return _cdiv(a, b) * b


def _row_align(*dtypes):
    # Minimum sublane multiple for the narrowest streamed dtype:
    # f32 -> 8, bf16 -> 16, int8/fp8 -> 32.
    return max(max(8, 32 // jnp.dtype(d).itemsize) for d in dtypes)


# --------------------------------------------------------------------------
# Fused DistillLoss kernel
# --------------------------------------------------------------------------
def _distill_kernel(s_cls_ref, t_cls_ref, feat_ref, score_ref, tgt_ref,
                    out_ref, feat_acc, score_acc, *,
                    inv_temp, temp_sq, n_feat, n_score, n_cls_rows,
                    tile_f, tile_s, tiles_per_core,
                    feat_rows, score_rows, feat_ragged, score_ragged):
    c = pl.program_id(0)                    # TensorCore slice ("parallel")
    i = pl.program_id(1)                    # streaming step ("arbitrary")
    last = pl.num_programs(1) - 1
    step = c * tiles_per_core + i           # global (unclamped) streaming step

    @pl.when(i == 0)
    def _init():
        feat_acc[...] = jnp.zeros_like(feat_acc)
        score_acc[...] = jnp.zeros_like(score_acc)

    # ---- WrapLoss stand-in: streamed, lane-parallel partial sums (VPU only) --
    f_row0 = step * tile_f

    @pl.when(f_row0 < feat_rows)            # skip clamped / out-of-range repeats
    def _feat():
        f = feat_ref[...].astype(jnp.float32)
        f2 = f * f
        if feat_ragged:                     # mask garbage rows of the edge block
            rows = f_row0 + jax.lax.broadcasted_iota(jnp.int32, f2.shape, 0)
            f2 = jnp.where(rows < feat_rows, f2, 0.0)
        feat_acc[...] += jnp.sum(f2.reshape(-1, SUBLANE, LANE), axis=0)

    s_row0 = step * tile_s

    @pl.when(s_row0 < score_rows)
    def _score():
        s = score_ref[...].astype(jnp.float32)
        t = tgt_ref[...].astype(jnp.float32)
        d = s - t
        ad = jnp.abs(d)
        sl1 = jnp.where(ad < 1.0, 0.5 * d * d, ad - 0.5)     # smooth-L1 (beta=1)
        if score_ragged:
            rows = s_row0 + jax.lax.broadcasted_iota(jnp.int32, sl1.shape, 0)
            sl1 = jnp.where(rows < score_rows, sl1, 0.0)
        score_acc[...] += jnp.sum(sl1.reshape(-1, SUBLANE, LANE), axis=0)

    # ---- per-core finalize: one XLU collapse; JS divergence on core 0 only ---
    @pl.when(i == last)
    def _finalize():
        feat_loss = 0.5 * jnp.sum(feat_acc[...]) / n_feat     # this core's partial
        score_loss = jnp.sum(score_acc[...]) / n_score        # this core's partial
        out_ref[0, 0] = feat_loss
        out_ref[0, 1] = score_loss
        out_ref[0, 2] = jnp.float32(0.0)
        out_ref[0, 3] = feat_loss + score_loss

        @pl.when(c == 0)
        def _js():
            sc = s_cls_ref[...].astype(jnp.float32) * inv_temp
            tc = t_cls_ref[...].astype(jnp.float32) * inv_temp

            def softmax_and_logsoftmax(x):
                m = jnp.max(x, axis=-1, keepdims=True)
                z = x - m
                ez = jnp.exp(z)                         # one exp pass, reused
                se = jnp.sum(ez, axis=-1, keepdims=True)
                return ez / se, z - jnp.log(se)

            p, lp = softmax_and_logsoftmax(sc)
            q, lq = softmax_and_logsoftmax(tc)
            mix = 0.5 * (p + q)
            lm = jnp.log(jnp.maximum(mix, jnp.float32(1e-30)))  # underflow guard
            kl_pm = jnp.sum(p * (lp - lm))
            kl_qm = jnp.sum(q * (lq - lm))
            # KLDivLoss(reduction='batchmean') on [N, C] logits, KD temp^2.
            js = 0.5 * (kl_pm + kl_qm) / n_cls_rows * temp_sq
            out_ref[0, 2] = js
            out_ref[0, 3] = feat_loss + score_loss + js


# --------------------------------------------------------------------------
# Wrapper
# --------------------------------------------------------------------------
def _as_slab(x, align_rows):
    """Flatten to a lane-dense [rows, 128] slab.

    Pads only up to the next (align_rows*128)-element boundary; when the
    element count is already aligned (the common case for conv feature maps)
    this is a zero-copy reshape.  Zero padding is exact for both stand-in
    terms (0^2 == 0; score==target==0 => smooth-L1 == 0)."""
    flat = x.reshape(-1)
    n = flat.shape[0]
    padded = _round_up(max(n, 1), align_rows * LANE)
    if padded != n:
        flat = jnp.pad(flat, (0, padded - n))
    return flat.reshape(padded // LANE, LANE)


@functools.partial(jax.jit, static_argnames=("temp",))
def distill_loss(s_feat, s_score, s_pred_cls, t_pred_cls, targets, temp=4.0):
    n_feat = math.prod(s_feat.shape)
    n_score = math.prod(s_score.shape)

    align_f = _row_align(s_feat.dtype)
    align_s = _row_align(s_score.dtype, targets.dtype)

    feat2d = _as_slab(s_feat, align_f)
    score2d = _as_slab(s_score, align_s)
    tgt2d = _as_slab(targets, align_s)

    feat_rows = feat2d.shape[0]
    score_rows = score2d.shape[0]

    # Independent tile sizes for the two streams (score no longer padded/tiled
    # to the feat tile count).
    tile_f = min(_round_up(TILE_ROWS, align_f), feat_rows)
    tile_s = min(_round_up(TILE_ROWS, align_s), score_rows)
    feat_tiles = _cdiv(feat_rows, tile_f)
    score_tiles = _cdiv(score_rows, tile_s)
    total_steps = max(feat_tiles, score_tiles)

    # v7x: split the streaming axis across both TensorCores; serial (and
    # harmless) on 1-TC v5e/v6e.
    num_cores = 2 if total_steps >= 2 else 1
    tpc = _cdiv(total_steps, num_cores)

    def feat_idx(c, i):
        return (jnp.minimum(c * tpc + i, feat_tiles - 1), 0)

    def score_idx(c, i):
        # Clamped repeat => identical block index => Pallas skips the re-DMA.
        return (jnp.minimum(c * tpc + i, score_tiles - 1), 0)

    cls_nd_s = s_pred_cls.ndim
    cls_nd_t = t_pred_cls.ndim

    stream_bytes = LANE * (tile_f * feat2d.dtype.itemsize
                           + tile_s * (score2d.dtype.itemsize
                                       + tgt2d.dtype.itemsize))
    cls_bytes = (s_pred_cls.size * s_pred_cls.dtype.itemsize
                 + t_pred_cls.size * t_pred_cls.dtype.itemsize)
    # Double-buffered streamed blocks + resident logits + accumulators + slack.
    vmem_limit = int(min(MAX_VMEM,
                         max(16 << 20,
                             2 * stream_bytes + 2 * cls_bytes + (4 << 20))))

    n_cls = s_pred_cls.size
    cost = pl.CostEstimate(
        flops=3 * n_feat + 6 * n_score + 30 * n_cls,
        transcendentals=3 * n_cls,
        bytes_accessed=(feat2d.size * feat2d.dtype.itemsize
                        + score2d.size * score2d.dtype.itemsize
                        + tgt2d.size * tgt2d.dtype.itemsize
                        + cls_bytes + 16 * num_cores),
    )

    kernel = functools.partial(
        _distill_kernel,
        inv_temp=1.0 / float(temp),
        temp_sq=float(temp) * float(temp),
        n_feat=n_feat,
        n_score=n_score,
        n_cls_rows=s_pred_cls.shape[0],         # batchmean denominator
        tile_f=tile_f,
        tile_s=tile_s,
        tiles_per_core=tpc,
        feat_rows=feat_rows,
        score_rows=score_rows,
        feat_ragged=(feat_rows % tile_f != 0),
        score_ragged=(score_rows % tile_s != 0),
    )

    out = pl.pallas_call(
        kernel,
        out_shape=jax.ShapeDtypeStruct((num_cores, 4), jnp.float32),
        grid=(num_cores, tpc),
        in_specs=[
            pl.BlockSpec(s_pred_cls.shape, lambda c, i: (0,) * cls_nd_s),  # resident
            pl.BlockSpec(t_pred_cls.shape, lambda c, i: (0,) * cls_nd_t),  # resident
            pl.BlockSpec((tile_f, LANE), feat_idx),                        # streamed
            pl.BlockSpec((tile_s, LANE), score_idx),                       # streamed
            pl.BlockSpec((tile_s, LANE), score_idx),                       # streamed
        ],
        out_specs=pl.BlockSpec((1, 4), lambda c, i: (c, 0),
                               memory_space=pltpu.MemorySpace.SMEM),
        scratch_shapes=[
            pltpu.VMEM((SUBLANE, LANE), jnp.float32),  # lane-parallel feat partials
            pltpu.VMEM((SUBLANE, LANE), jnp.float32),  # lane-parallel score partials
        ],
        compiler_params=pltpu.CompilerParams(
            dimension_semantics=("parallel", "arbitrary"),
            vmem_limit_bytes=vmem_limit),
        cost_estimate=cost,
    )(s_pred_cls, jax.lax.stop_gradient(t_pred_cls),  # .detach() equivalent
      feat2d, score2d, tgt2d)

    # Sum the per-core partial rows (core 1's JS slot is 0 by construction).
    loss_item = jnp.sum(out[:, :3], axis=0)   # [wrap_feat, wrap_score, jsdiv]
    total = jnp.sum(out[:, 3])
    return total, loss_item


if __name__ == "__main__":
    key = jax.random.PRNGKey(0)
    k1, k2, k3, k4, k5 = jax.random.split(key, 5)

    B, C, H, W = 2, 4, 16, 16      # student feature map (NCHW)
    N_CLS_ROWS, N_CLASSES = 8, 32  # class-logit matrix [N, C]

    s_feat = jax.random.normal(k1, (B, C, H, W), dtype=jnp.float32)
    s_score = jax.random.normal(k2, (B, 1, H, W), dtype=jnp.float32)
    targets = jax.random.normal(k3, (B, 1, H, W), dtype=jnp.float32)
    s_pred_cls = jax.random.normal(k4, (N_CLS_ROWS, N_CLASSES), dtype=jnp.float32)
    t_pred_cls = jax.random.normal(k5, (N_CLS_ROWS, N_CLASSES), dtype=jnp.float32)

    loss, loss_item = distill_loss(s_feat, s_score, s_pred_cls, t_pred_cls, targets)
    jax.block_until_ready((loss, loss_item))
    assert loss.shape == () and loss_item.shape == (3,)
    assert bool(jnp.isfinite(loss)) and bool(jnp.all(jnp.isfinite(loss_item)))
    print("KERNEL_OK")
</pallas_src>

<mosaic_0001>
module attributes {stable_mosaic.version = 11 : i64} {
  func.func @_distill_kernel(%arg0: i32, %arg1: i32, %arg2: memref<8x32xf32, #tpu.memory_space<vmem>>, %arg3: memref<8x32xf32, #tpu.memory_space<vmem>>, %arg4: memref<16x128xf32, #tpu.memory_space<vmem>>, %arg5: memref<8x128xf32, #tpu.memory_space<vmem>>, %arg6: memref<8x128xf32, #tpu.memory_space<vmem>>, %arg7: memref<1x4xf32, #tpu.memory_space<smem>>, %arg8: memref<8x128xf32, #tpu.memory_space<vmem>>, %arg9: memref<8x128xf32, #tpu.memory_space<vmem>>) attributes {dimension_semantics = [#tpu.dimension_semantics<parallel>, #tpu.dimension_semantics<arbitrary>], iteration_bounds = array<i64: 1, 1>, scalar_prefetch = 0 : i64, scratch_operands = 2 : i64, tpu.core_type = #tpu.core_type<tc>, window_params = [{pipeline_mode = #tpu.pipeline_mode<synchronous>, transform_indices = @transform_0, window_bounds = array<i64: 8, 32>}, {pipeline_mode = #tpu.pipeline_mode<synchronous>, transform_indices = @transform_1, window_bounds = array<i64: 8, 32>}, {transform_indices = @transform_2, window_bounds = array<i64: 16, 128>}, {transform_indices = @transform_3, window_bounds = array<i64: 8, 128>}, {transform_indices = @transform_4, window_bounds = array<i64: 8, 128>}, {transform_indices = @transform_5, window_bounds = array<i64: 1, 4>}]} {
    %c1_i32 = arith.constant 1 : i32
    %0 = arith.muli %arg0, %c1_i32 : i32
    %1 = arith.addi %0, %arg1 : i32
    %c0_i32 = arith.constant 0 : i32
    %2 = arith.cmpi eq, %arg1, %c0_i32 : i32
    %3 = arith.extui %2 : i1 to i32
    %c0_i32_0 = arith.constant 0 : i32
    %4 = arith.cmpi ne, %3, %c0_i32_0 : i32
    scf.if %4 {
      %cst = arith.constant 0.000000e+00 : f32
      %16 = vector.broadcast %cst : f32 to vector<8x128xf32>
      %c0 = arith.constant 0 : index
      %c0_7 = arith.constant 0 : index
      %17 = vector.load %arg8[%c0, %c0_7] : memref<8x128xf32, #tpu.memory_space<vmem>>, vector<8x128xf32>
      tpu.vector_store %arg8[%c0, %c0_7], %16 {strides = array<i32>} : memref<8x128xf32, #tpu.memory_space<vmem>>, vector<8x128xf32>,
      %cst_8 = arith.constant 0.000000e+00 : f32
      %18 = vector.broadcast %cst_8 : f32 to vector<8x128xf32>
      %c0_9 = arith.constant 0 : index
      %c0_10 = arith.constant 0 : index
      %19 = vector.load %arg9[%c0_9, %c0_10] : memref<8x128xf32, #tpu.memory_space<vmem>>, vector<8x128xf32>
      tpu.vector_store %arg9[%c0_9, %c0_10], %18 {strides = array<i32>} : memref<8x128xf32, #tpu.memory_space<vmem>>, vector<8x128xf32>,
    } else {
    }
    %c16_i32 = arith.constant 16 : i32
    %5 = arith.muli %1, %c16_i32 : i32
    %c16_i32_1 = arith.constant 16 : i32
    %6 = arith.cmpi slt, %5, %c16_i32_1 : i32
    %7 = arith.extui %6 : i1 to i32
    %c0_i32_2 = arith.constant 0 : i32
    %8 = arith.cmpi ne, %7, %c0_i32_2 : i32
    scf.if %8 {
      %c0 = arith.constant 0 : index
      %c0_7 = arith.constant 0 : index
      %16 = vector.load %arg4[%c0, %c0_7] : memref<16x128xf32, #tpu.memory_space<vmem>>, vector<16x128xf32>
      %17 = arith.mulf %16, %16 : vector<16x128xf32>
      %c0_8 = arith.constant 0 : index
      %c0_9 = arith.constant 0 : index
      %18 = vector.load %arg8[%c0_8, %c0_9] : memref<8x128xf32, #tpu.memory_space<vmem>>, vector<8x128xf32>
      %19 = vector.shape_cast %17 : vector<16x128xf32> to vector<2x8x128xf32>
      %cst = arith.constant dense<0.000000e+00> : vector<8x128xf32>
      %20 = vector.multi_reduction <add>, %19, %cst [0] : vector<2x8x128xf32> to vector<8x128xf32>
      %21 = arith.addf %18, %20 : vector<8x128xf32>
      %c0_10 = arith.constant 0 : index
      %c0_11 = arith.constant 0 : index
      %22 = vector.load %arg8[%c0_10, %c0_11] : memref<8x128xf32, #tpu.memory_space<vmem>>, vector<8x128xf32>
      tpu.vector_store %arg8[%c0_10, %c0_11], %21 {strides = array<i32>} : memref<8x128xf32, #tpu.memory_space<vmem>>, vector<8x128xf32>,
    } else {
    }
    %c8_i32 = arith.constant 8 : i32
    %9 = arith.muli %1, %c8_i32 : i32
    %c8_i32_3 = arith.constant 8 : i32
    %10 = arith.cmpi slt, %9, %c8_i32_3 : i32
    %11 = arith.extui %10 : i1 to i32
    %c0_i32_4 = arith.constant 0 : i32
    %12 = arith.cmpi ne, %11, %c0_i32_4 : i32
    scf.if %12 {
      %c0 = arith.constant 0 : index
      %c0_7 = arith.constant 0 : index
      %16 = vector.load %arg5[%c0, %c0_7] : memref<8x128xf32, #tpu.memory_space<vmem>>, vector<8x128xf32>
      %c0_8 = arith.constant 0 : index
      %c0_9 = arith.constant 0 : index
      %17 = vector.load %arg6[%c0_8, %c0_9] : memref<8x128xf32, #tpu.memory_space<vmem>>, vector<8x128xf32>
      %18 = arith.subf %16, %17 : vector<8x128xf32>
      %19 = math.absf %18 : vector<8x128xf32>
      %cst = arith.constant 1.000000e+00 : f32
      %20 = vector.broadcast %cst : f32 to vector<8x128xf32>
      %21 = arith.cmpf olt, %19, %20 : vector<8x128xf32>
      %cst_10 = arith.constant 5.000000e-01 : f32
      %22 = vector.broadcast %cst_10 : f32 to vector<8x128xf32>
      %23 = arith.mulf %22, %18 : vector<8x128xf32>
      %24 = arith.mulf %23, %18 : vector<8x128xf32>
      %cst_11 = arith.constant 5.000000e-01 : f32
      %25 = vector.broadcast %cst_11 : f32 to vector<8x128xf32>
      %26 = arith.subf %19, %25 : vector<8x128xf32>
      %27 = arith.select %21, %24, %26 : vector<8x128xi1>, vector<8x128xf32>
      %c0_12 = arith.constant 0 : index
      %c0_13 = arith.constant 0 : index
      %28 = vector.load %arg9[%c0_12, %c0_13] : memref<8x128xf32, #tpu.memory_space<vmem>>, vector<8x128xf32>
      %29 = vector.shape_cast %27 : vector<8x128xf32> to vector<1x8x128xf32>
      %cst_14 = arith.constant dense<0.000000e+00> : vector<8x128xf32>
      %30 = vector.multi_reduction <add>, %29, %cst_14 [0] : vector<1x8x128xf32> to vector<8x128xf32>
      %31 = arith.addf %28, %30 : vector<8x128xf32>
      %c0_15 = arith.constant 0 : index
      %c0_16 = arith.constant 0 : index
      %32 = vector.load %arg9[%c0_15, %c0_16] : memref<8x128xf32, #tpu.memory_space<vmem>>, vector<8x128xf32>
      tpu.vector_store %arg9[%c0_15, %c0_16], %31 {strides = array<i32>} : memref<8x128xf32, #tpu.memory_space<vmem>>, vector<8x128xf32>,
    } else {
    }
    %c0_i32_5 = arith.constant 0 : i32
    %13 = arith.cmpi eq, %arg1, %c0_i32_5 : i32
    %14 = arith.extui %13 : i1 to i32
    %c0_i32_6 = arith.constant 0 : i32
    %15 = arith.cmpi ne, %14, %c0_i32_6 : i32
    scf.if %15 {
      %c0 = arith.constant 0 : index
      %c0_7 = arith.constant 0 : index
      %16 = vector.load %arg8[%c0, %c0_7] : memref<8x128xf32, #tpu.memory_space<vmem>>, vector<8x128xf32>
      %17 = vector.shape_cast %16 : vector<8x128xf32> to vector<1x8x128xf32>
      %cst = arith.constant dense<0.000000e+00> : vector<1xf32>
      %18 = vector.multi_reduction <add>, %17, %cst [1, 2] : vector<1x8x128xf32> to vector<1xf32>
      %19 = vector.shape_cast %18 : vector<1xf32> to vector<1x1x1xf32>
      %20 = vector.extract %19[0, 0, 0] : f32 from vector<1x1x1xf32>
      %cst_8 = arith.constant 5.000000e-01 : f32
      %21 = arith.mulf %cst_8, %20 : f32
      %cst_9 = arith.constant 2.048000e+03 : f32
      %22 = arith.divf %21, %cst_9 : f32
      %c0_10 = arith.constant 0 : index
      %c0_11 = arith.constant 0 : index
      %23 = vector.load %arg9[%c0_10, %c0_11] : memref<8x128xf32, #tpu.memory_space<vmem>>, vector<8x128xf32>
      %24 = vector.shape_cast %23 : vector<8x128xf32> to vector<1x8x128xf32>
      %cst_12 = arith.constant dense<0.000000e+00> : vector<1xf32>
      %25 = vector.multi_reduction <add>, %24, %cst_12 [1, 2] : vector<1x8x128xf32> to vector<1xf32>
      %26 = vector.shape_cast %25 : vector<1xf32> to vector<1x1x1xf32>
      %27 = vector.extract %26[0, 0, 0] : f32 from vector<1x1x1xf32>
      %cst_13 = arith.constant 5.120000e+02 : f32
      %28 = arith.divf %27, %cst_13 : f32
      %c0_14 = arith.constant 0 : index
      %c0_15 = arith.constant 0 : index
      %29 = memref.load %arg7[%c0_14, %c0_15] : memref<1x4xf32, #tpu.memory_space<smem>>
      memref.store %22, %arg7[%c0_14, %c0_15] : memref<1x4xf32, #tpu.memory_space<smem>>
      %c0_16 = arith.constant 0 : index
      %c1 = arith.constant 1 : index
      %30 = memref.load %arg7[%c0_16, %c1] : memref<1x4xf32, #tpu.memory_space<smem>>
      memref.store %28, %arg7[%c0_16, %c1] : memref<1x4xf32, #tpu.memory_space<smem>>
      %cst_17 = arith.constant 0.000000e+00 : f32
      %c0_18 = arith.constant 0 : index
      %c2 = arith.constant 2 : index
      %31 = memref.load %arg7[%c0_18, %c2] : memref<1x4xf32, #tpu.memory_space<smem>>
      memref.store %cst_17, %arg7[%c0_18, %c2] : memref<1x4xf32, #tpu.memory_space<smem>>
      %32 = arith.addf %22, %28 : f32
      %c0_19 = arith.constant 0 : index
      %c3 = arith.constant 3 : index
      %33 = memref.load %arg7[%c0_19, %c3] : memref<1x4xf32, #tpu.memory_space<smem>>
      memref.store %32, %arg7[%c0_19, %c3] : memref<1x4xf32, #tpu.memory_space<smem>>
      %c0_i32_20 = arith.constant 0 : i32
      %34 = arith.cmpi eq, %arg0, %c0_i32_20 : i32
      %35 = arith.extui %34 : i1 to i32
      %c0_i32_21 = arith.constant 0 : i32
      %36 = arith.cmpi ne, %35, %c0_i32_21 : i32
      scf.if %36 {
        %c0_22 = arith.constant 0 : index
        %c0_23 = arith.constant 0 : index
        %37 = vector.load %arg2[%c0_22, %c0_23] : memref<8x32xf32, #tpu.memory_space<vmem>>, vector<8x32xf32>
        %cst_24 = arith.constant 2.500000e-01 : f32
        %38 = vector.broadcast %cst_24 : f32 to vector<8x32xf32>
        %39 = arith.mulf %37, %38 : vector<8x32xf32>
        %c0_25 = arith.constant 0 : index
        %c0_26 = arith.constant 0 : index
        %40 = vector.load %arg3[%c0_25, %c0_26] : memref<8x32xf32, #tpu.memory_space<vmem>>, vector<8x32xf32>
        %cst_27 = arith.constant 2.500000e-01 : f32
        %41 = vector.broadcast %cst_27 : f32 to vector<8x32xf32>
        %42 = arith.mulf %40, %41 : vector<8x32xf32>
        %cst_28 = arith.constant dense<0xFF800000> : vector<8xf32>
        %43 = vector.multi_reduction <maximumf>, %39, %cst_28 [1] : vector<8x32xf32> to vector<8xf32>
        %44 = vector.shape_cast %43 : vector<8xf32> to vector<8x1xf32>
        %45 = vector.broadcast %44 : vector<8x1xf32> to vector<8x32xf32>
        %46 = arith.subf %39, %45 : vector<8x32xf32>
        %47 = math.exp %46 : vector<8x32xf32>
        %cst_29 = arith.constant dense<0.000000e+00> : vector<8xf32>
        %48 = vector.multi_reduction <add>, %47, %cst_29 [1] : vector<8x32xf32> to vector<8xf32>
        %49 = vector.shape_cast %48 : vector<8xf32> to vector<8x1xf32>
        %50 = vector.broadcast %49 : vector<8x1xf32> to vector<8x32xf32>
        %51 = arith.divf %47, %50 : vector<8x32xf32>
        %52 = math.log %49 : vector<8x1xf32>
        %53 = vector.broadcast %52 : vector<8x1xf32> to vector<8x32xf32>
        %54 = arith.subf %46, %53 : vector<8x32xf32>
        %cst_30 = arith.constant dense<0xFF800000> : vector<8xf32>
        %55 = vector.multi_reduction <maximumf>, %42, %cst_30 [1] : vector<8x32xf32> to vector<8xf32>
        %56 = vector.shape_cast %55 : vector<8xf32> to vector<8x1xf32>
        %57 = vector.broadcast %56 : vector<8x1xf32> to vector<8x32xf32>
        %58 = arith.subf %42, %57 : vector<8x32xf32>
        %59 = math.exp %58 : vector<8x32xf32>
        %cst_31 = arith.constant dense<0.000000e+00> : vector<8xf32>
        %60 = vector.multi_reduction <add>, %59, %cst_31 [1] : vector<8x32xf32> to vector<8xf32>
        %61 = vector.shape_cast %60 : vector<8xf32> to vector<8x1xf32>
        %62 = vector.broadcast %61 : vector<8x1xf32> to vector<8x32xf32>
        %63 = arith.divf %59, %62 : vector<8x32xf32>
        %64 = math.log %61 : vector<8x1xf32>
        %65 = vector.broadcast %64 : vector<8x1xf32> to vector<8x32xf32>
        %66 = arith.subf %58, %65 : vector<8x32xf32>
        %67 = arith.addf %51, %63 : vector<8x32xf32>
        %cst_32 = arith.constant 5.000000e-01 : f32
        %68 = vector.broadcast %cst_32 : f32 to vector<8x32xf32>
        %69 = arith.mulf %68, %67 : vector<8x32xf32>
        %cst_33 = arith.constant 1.000000e-30 : f32
        %70 = vector.broadcast %cst_33 : f32 to vector<8x32xf32>
        %71 = arith.maximumf %69, %70 : vector<8x32xf32>
        %72 = math.log %71 : vector<8x32xf32>
        %73 = arith.subf %54, %72 : vector<8x32xf32>
        %74 = arith.mulf %51, %73 : vector<8x32xf32>
        %75 = vector.shape_cast %74 : vector<8x32xf32> to vector<1x8x32xf32>
        %cst_34 = arith.constant dense<0.000000e+00> : vector<1xf32>
        %76 = vector.multi_reduction <add>, %75, %cst_34 [1, 2] : vector<1x8x32xf32> to vector<1xf32>
        %77 = vector.shape_cast %76 : vector<1xf32> to vector<1x1x1xf32>
        %78 = vector.extract %77[0, 0, 0] : f32 from vector<1x1x1xf32>
        %79 = arith.subf %66, %72 : vector<8x32xf32>
        %80 = arith.mulf %63, %79 : vector<8x32xf32>
        %81 = vector.shape_cast %80 : vector<8x32xf32> to vector<1x8x32xf32>
        %cst_35 = arith.constant dense<0.000000e+00> : vector<1xf32>
        %82 = vector.multi_reduction <add>, %81, %cst_35 [1, 2] : vector<1x8x32xf32> to vector<1xf32>
        %83 = vector.shape_cast %82 : vector<1xf32> to vector<1x1x1xf32>
        %84 = vector.extract %83[0, 0, 0] : f32 from vector<1x1x1xf32>
        %85 = arith.addf %78, %84 : f32
        %cst_36 = arith.constant 5.000000e-01 : f32
        %86 = arith.mulf %cst_36, %85 : f32
        %cst_37 = arith.constant 8.000000e+00 : f32
        %87 = arith.divf %86, %cst_37 : f32
        %cst_38 = arith.constant 1.600000e+01 : f32
        %88 = arith.mulf %87, %cst_38 : f32
        %c0_39 = arith.constant 0 : index
        %c2_40 = arith.constant 2 : index
        %89 = memref.load %arg7[%c0_39, %c2_40] : memref<1x4xf32, #tpu.memory_space<smem>>
        memref.store %88, %arg7[%c0_39, %c2_40] : memref<1x4xf32, #tpu.memory_space<smem>>
        %90 = arith.addf %22, %28 : f32
        %91 = arith.addf %90, %88 : f32
        %c0_41 = arith.constant 0 : index
        %c3_42 = arith.constant 3 : index
        %92 = memref.load %arg7[%c0_41, %c3_42] : memref<1x4xf32, #tpu.memory_space<smem>>
        memref.store %91, %arg7[%c0_41, %c3_42] : memref<1x4xf32, #tpu.memory_space<smem>>
      } else {
      }
    } else {
    }
    return
  }
  func.func @transform_0(%arg0: i32, %arg1: i32) -> (i32, i32) {
    %c0_i32 = arith.constant 0 : i32
    %c0_i32_0 = arith.constant 0 : i32
    %c0_i32_1 = arith.constant 0 : i32
    return %c0_i32, %c0_i32_0 : i32, i32
  }
  func.func @transform_1(%arg0: i32, %arg1: i32) -> (i32, i32) {
    %c0_i32 = arith.constant 0 : i32
    %c0_i32_0 = arith.constant 0 : i32
    %c0_i32_1 = arith.constant 0 : i32
    return %c0_i32, %c0_i32_0 : i32, i32
  }
  func.func @transform_2(%arg0: i32, %arg1: i32) -> (i32, i32) {
    %c1_i32 = arith.constant 1 : i32
    %0 = arith.muli %arg0, %c1_i32 : i32
    %1 = arith.addi %0, %arg1 : i32
    %c0_i32 = arith.constant 0 : i32
    %2 = arith.minsi %1, %c0_i32 : i32
    %c0_i32_0 = arith.constant 0 : i32
    %c0_i32_1 = arith.constant 0 : i32
    return %2, %c0_i32_0 : i32, i32
  }
  func.func @transform_3(%arg0: i32, %arg1: i32) -> (i32, i32) {
    %c1_i32 = arith.constant 1 : i32
    %0 = arith.muli %arg0, %c1_i32 : i32
    %1 = arith.addi %0, %arg1 : i32
    %c0_i32 = arith.constant 0 : i32
    %2 = arith.minsi %1, %c0_i32 : i32
    %c0_i32_0 = arith.constant 0 : i32
    %c0_i32_1 = arith.constant 0 : i32
    return %2, %c0_i32_0 : i32, i32
  }
  func.func @transform_4(%arg0: i32, %arg1: i32) -> (i32, i32) {
    %c1_i32 = arith.constant 1 : i32
    %0 = arith.muli %arg0, %c1_i32 : i32
    %1 = arith.addi %0, %arg1 : i32
    %c0_i32 = arith.constant 0 : i32
    %2 = arith.minsi %1, %c0_i32 : i32
    %c0_i32_0 = arith.constant 0 : i32
    %c0_i32_1 = arith.constant 0 : i32
    return %2, %c0_i32_0 : i32, i32
  }
  func.func @transform_5(%arg0: i32, %arg1: i32) -> (i32, i32) {
    %c0_i32 = arith.constant 0 : i32
    %c0_i32_0 = arith.constant 0 : i32
    return %arg0, %c0_i32 : i32, i32
  }
}

</mosaic_0001>

<bundles_post_ra>
// kernel: distill_loss.1
= control target key start
LH: loop header
LB: loop body
LE: loop exit
PB: predicated region body
PF: predicated region fallthrough
CT: control target
= control target key end

     0   :  { %vm204_vm0 = vcmask 261120   ;;  %s459_s0 = inlined_call_operand.vmem [shape: f32[8,32], index: 0, kind: input, shape index: {}]   ;;  %s460_s1 = inlined_call_operand.vmem [shape: f32[8,32], index: 1, kind: input, shape index: {}]   ;;  %s461_s2 = inlined_call_operand.vmem [shape: f32[16,128], index: 2, kind: input, shape index: {}]   ;;  %s462_s3 = inlined_call_operand.vmem [shape: f32[8,128], index: 3, kind: input, shape index: {}]   ;;  %s463_s4 = inlined_call_operand.vmem [shape: f32[8,128], index: 4, kind: input, shape index: {}]   ;;  %s464_s5 = inlined_call_operand.vmem [shape: f32[1,4], index: 5, kind: output, shape index: {}]  }
   0x1   :  { %v200_v0 = vld [vmem:[%s459_s0] sm:$0xff] }
   0x2   :  { %10 = vsyncpa [#allocation5], 0  ;;  %v201_v1 = vmul.f32 0.25, %v200_v0  ;;  %v202_v2 = vld [vmem:[%s460_s1] sm:$0xff]  ;;  %v120_v17 = vld [vmem:[%s461_s2 + $0x8] sm:$0xff]  ;;  %s308_s15 = sshll.u32 %s464_s5, 4  ;;  %s309_s15 = int_to_ptr.vmem [resolvable:$true] %s308_s15 }
   0x3   :  { %v203_v4 = vmul.f32 0.25, %v202_v2  ;;  %v119_v16 = vld [vmem:[%s461_s2] sm:$0xff]  ;;  %v122_v20 = vmul.f32 %v120_v17, %v120_v17  ;;  %v391_v17 = vmov 512.0   ;;  %s393_s19 = smov [#allocation4]  }
   0x4   :  { %v205_v3 = vsel %vm204_vm0, %v201_v1, -inf  ;;  %v132_v18 = vld [vmem:[%s462_s3] sm:$0xff]  ;;  %v121_v19 = vmul.f32 %v119_v16, %v119_v16  ;;  %v390_v16 = vmov 2048.0  }
   0x5   :  { %206 = vmax.xlane.f32.xlu0 %v205_v3  ;;  %v232_v5 = vsel %vm204_vm0, %v203_v4, -inf  ;;  %v133_v21 = vld [vmem:[%s463_s4] sm:$0xff] }
   0x6   :  { %v134_v22 = vsub.f32 %v132_v18, %v133_v21  ;;  %v124_v23 = vadd.f32 %v122_v20, %v121_v19 }
   0x8   :  { %v135_v24 = vand.u32 2147483647, %v134_v22  ;;  %v137_v25 = vmul.f32 0.5, %v134_v22  ;;  %149 = vadd.xlane.f32.xlu2 %v124_v23 }
   0xa   :  { %v138_v26 = vmul.f32 %v137_v25, %v134_v22  ;;  %v336_v27 = vadd.f32 -0.5, %v135_v24  ;;  %vm136_vm1 = vcmp.lt.f32.partialorder %v135_v24, 1.0 }
   0xc   :  { %v140_v28 = vsel %vm136_vm1, %v138_v26, %v336_v27 }
   0xd   :  { %233 = vmax.xlane.f32.xlu0 %v232_v5 }
  0x10   :  { %169 = vadd.xlane.f32.xlu2 %v140_v28 }
  0x78   :  { %v207_v6 = vpop.xlane.xlu0 %206 }
  0x79   :  { %v432_v7 = vsub.f32 %v201_v1, %v207_v6 }
  0x7b   :  { %v209_v8 = vmul.f32 1.442695, %v432_v7  ;;  %v150_v6 = vpop.xlane.xlu2 %149 }
  0x7d   :  { %356 = vpow2.f32 %v209_v8  ;;  %v151_v8 = vrot.slane %v150_v6, 4 }
  0x80   :  { %v234_v9 = vpop.xlane.xlu0 %233 }
  0x81   :  { %v435_v10 = vsub.f32 %v203_v4, %v234_v9  ;;  %v152_v9 = vadd.f32 %v151_v8, %v150_v6 }
  0x83   :  { %v357_v11 = vpop.eup %356  ;;  %v236_v12 = vmul.f32 1.442695, %v435_v10 }
  0x84   :  { %v211_v13 = vsel %vm204_vm0, %v357_v11, 0.0 }
  0x85   :  { %358 = vpow2.f32 %v236_v12  ;;  %212 = vadd.xlane.f32.xlu1 %v211_v13  ;;  %v170_v13 = vpop.xlane.xlu2 %169 }
  0x8b   :  { %v359_v14 = vpop.eup %358 }
  0x8c   :  { %v238_v15 = vsel %vm204_vm0, %v359_v14, 0.0 }
  0x8d   :  { %239 = vadd.xlane.f32.xlu1 %v238_v15 }
  0xf8   :  { %v213_v29 = vpop.xlane.xlu1 %212 }
  0xf9   :  { %360 = vrcp.f32 %v213_v29  ;;  %v225_v38 = vand.u32 2147483648, %v213_v29  ;;  %vm219_vm3 = vweird.f32 %v213_v29  ;;  %v223_v39 = vand.u32 2147483647, %v213_v29 }
  0xfb   :  { %v226_v45 = vor.u32 1.1754944e-38, %v225_v38  ;;  %vm224_vm6 = vcmp.eq.f32.partialorder %v223_v39, 8.507059e+37 }
  0xff   :  { %v361_v30 = vpop.eup %360 }
 0x100   :  { %v215_v31 = vmul.f32 %v361_v30, %v213_v29  ;;  %v240_v32 = vpop.xlane.xlu1 %239  ;;  %vm220_vm2 = vweird.f32 %v361_v30 }
 0x101   :  { %362 = vrcp.f32 %v240_v32  ;;  %vm221_vm4 = vmor %vm219_vm3, %vm220_vm2  ;;  %v252_v41 = vand.u32 2147483648, %v240_v32  ;;  %v250_v44 = vand.u32 2147483647, %v240_v32  ;;  %vm246_vm7 = vweird.f32 %v240_v32 }
 0x102   :  { %v216_v33 = vsub.f32 1.0, %v215_v31  ;;  %364 = vlog2.f32 %v213_v29 }
 0x103   :  { %v253_v48 = vor.u32 1.1754944e-38, %v252_v41  ;;  %vm251_vm9 = vcmp.eq.f32.partialorder %v250_v44, 8.507059e+37  ;;  %366 = vlog2.f32 %v240_v32 }
 0x104   :  { %v217_v34 = vmul.f32 %v361_v30, %v216_v33 }
 0x106   :  { %v218_v37 = vadd.f32 %v361_v30, %v217_v34  ;;  %v392_v34 = vmov 8.0  }
 0x107   :  { %v363_v35 = vpop.eup %362 }
 0x108   :  { %v242_v36 = vmul.f32 %v363_v35, %v240_v32  ;;  %v222_v42 = vsel %vm221_vm4, %v361_v30, %v218_v37  ;;  %vm247_vm5 = vweird.f32 %v363_v35  ;;  %v365_v56 = vpop.eup %364 }
 0x109   :  { %v227_v47 = vsel %vm224_vm6, %v226_v45, %v222_v42  ;;  %vm248_vm8 = vmor %vm246_vm7, %vm247_vm5  ;;  %v367_v57 = vpop.eup %366  ;;  %v230_v59 = vmul.f32 0.6931472, %v365_v56 }
 0x10a   :  { %v243_v40 = vsub.f32 1.0, %v242_v36  ;;  %v228_v51 = vmul.f32 %v357_v11, %v227_v47  ;;  %v257_v58 = vmul.f32 0.6931472, %v367_v57  ;;  %v153_v11 = vrot.slane %v152_v9, 2 }
 0x10b   :  { %v231_v63 = vsub.f32 %v432_v7, %v230_v59 }
 0x10c   :  { %v244_v43 = vmul.f32 %v363_v35, %v243_v40  ;;  %v258_v61 = vsub.f32 %v435_v10, %v257_v58  ;;  %v154_v12 = vadd.f32 %v153_v11, %v152_v9  ;;  %v171_v10 = vrot.slane %v170_v13, 4 }
 0x10e   :  { %v245_v46 = vadd.f32 %v363_v35, %v244_v43  ;;  %v172_v7 = vadd.f32 %v171_v10, %v170_v13 }
 0x110   :  { %v249_v49 = vsel %vm248_vm8, %v363_v35, %v245_v46  ;;  %v173_v18 = vrot.slane %v172_v7, 2 }
 0x111   :  { %v254_v50 = vsel %vm251_vm9, %v253_v48, %v249_v49 }
 0x112   :  { %v255_v52 = vmul.f32 %v359_v14, %v254_v50  ;;  %v155_v14 = vrot.slane %v154_v12, 1  ;;  %v174_v22 = vadd.f32 %v173_v18, %v172_v7 }
 0x114   :  { %v259_v53 = vadd.f32 %v255_v52, %v228_v51  ;;  %v156_v15 = vadd.f32 %v155_v14, %v154_v12  ;;  %v175_v27 = vrot.slane %v174_v22, 1 }
 0x116   :  { %v260_v54 = vmul.f32 0.5, %v259_v53  ;;  %337 = vpush %v156_v15  ;;  %v176_v30 = vadd.f32 %v175_v27, %v174_v22 }
 0x118   :  { %v261_v55 = vmax.f32 %v260_v54, 1e-30 }
 0x11a   :  { %368 = vlog2.f32 %v261_v55 }
 0x11b   :  { %370 = vrcp.f32 %v390_v16 }
 0x11c   :  { %372 = vrcp.f32 %v391_v17 }
 0x11d   :  { %374 = vrcp.f32 %v392_v34 }
 0x120   :  { %v369_v60 = vpop.eup %368 }
 0x121   :  { %v263_v62 = vmul.f32 0.6931472, %v369_v60  ;;  %v371_v19 = vpop.eup %370 }
 0x122   :  { %v373_v20 = vpop.eup %372  ;;  %v160_v21 = vmul.f32 2048.0, %v371_v19  ;;  %vm164_vm10 = vweird.f32 %v371_v19 }
 0x123   :  { %v276_v0 = vsub.f32 %v258_v61, %v263_v62  ;;  %v264_v1 = vsub.f32 %v231_v63, %v263_v62  ;;  %v179_v23 = vmul.f32 512.0, %v373_v20  ;;  %vm183_vm11 = vweird.f32 %v373_v20  ;;  %v375_v35 = vpop.eup %374 }
 0x124   :  { %v161_v24 = vsub.f32 1.0, %v160_v21  ;;  %v291_v36 = vmul.f32 8.0, %v375_v35  ;;  %vm295_vm12 = vweird.f32 %v375_v35 }
 0x125   :  { %v277_v2 = vmul.f32 %v276_v0, %v255_v52  ;;  %v265_v3 = vmul.f32 %v264_v1, %v228_v51  ;;  %v180_v25 = vsub.f32 1.0, %v179_v23 }
 0x126   :  { %v162_v26 = vmul.f32 %v371_v19, %v161_v24  ;;  %v292_v39 = vsub.f32 1.0, %v291_v36 }
 0x127   :  { %v278_v4 = vsel %vm204_vm0, %v277_v2, 0.0  ;;  %v266_v5 = vsel %vm204_vm0, %v265_v3, 0.0  ;;  %v181_v28 = vmul.f32 %v373_v20, %v180_v25 }
 0x128   :  { %279 = vadd.xlane.f32.xlu1 %v278_v4  ;;  %267 = vadd.xlane.f32.xlu0 %v266_v5  ;;  %v163_v29 = vadd.f32 %v371_v19, %v162_v26  ;;  %v293_v44 = vmul.f32 %v375_v35, %v292_v39 }
 0x129   :  { %v182_v31 = vadd.f32 %v373_v20, %v181_v28 }
 0x12a   :  { %v165_v32 = vsel %vm164_vm10, %v371_v19, %v163_v29  ;;  %v294_v49 = vadd.f32 %v375_v35, %v293_v44 }
 0x12b   :  { %339 = vpush %v165_v32  ;;  %v184_v33 = vsel %vm183_vm11, %v373_v20, %v182_v31 }
 0x12c   :  { %341 = vpush %v176_v30  ;;  %v296_v54 = vsel %vm295_vm12, %v375_v35, %v294_v49 }
 0x12d   :  { %343 = vpush %v184_v33 }
 0x147   :  { %s338_s2 = spop %337 }
 0x148   :  { %s158_s3 = smul.f32 0.5, %s338_s2 }
 0x15c   :  { %s340_s4 = spop %339 }
 0x15d   :  { %s167_s28 = smul.f32 %s340_s4, %s158_s3  ;;  %s342_s29 = spop %341 }
 0x15e   :  { %s344_s30 = spop %343 }
 0x15f   :  { %188 = sst [smem:[#allocation4]] %s167_s28  ;;  %s186_s6 = smul.f32 %s344_s30, %s342_s29 }
 0x161   :  { %190 = sst [smem:[#allocation4 + $0x1]] %s186_s6 }
 0x162   :  { %s193_s17 = sadd.f32 %s186_s6, %s167_s28 }
 0x19b   :  { %v280_v37 = vpop.xlane.xlu1 %279  ;;  %v268_v38 = vpop.xlane.xlu0 %267 }
 0x19c   :  { %v281_v40 = vrot.slane %v280_v37, 4  ;;  %v269_v41 = vrot.slane %v268_v38, 4 }
 0x19e   :  { %v282_v42 = vadd.f32 %v281_v40, %v280_v37  ;;  %v270_v43 = vadd.f32 %v269_v41, %v268_v38 }
 0x1a0   :  { %v283_v45 = vrot.slane %v282_v42, 2  ;;  %v271_v46 = vrot.slane %v270_v43, 2 }
 0x1a2   :  { %v284_v47 = vadd.f32 %v283_v45, %v282_v42  ;;  %v272_v48 = vadd.f32 %v271_v46, %v270_v43 }
 0x1a4   :  { %v273_v50 = vrot.slane %v272_v48, 1  ;;  %v285_v51 = vrot.slane %v284_v47, 1 }
 0x1a6   :  { %v274_v52 = vadd.f32 %v273_v50, %v272_v48  ;;  %v286_v53 = vadd.f32 %v285_v51, %v284_v47 }
 0x1a8   :  { %345 = vpush %v274_v52 }
 0x1a9   :  { %347 = vpush %v286_v53 }
 0x1aa   :  { %349 = vpush %v296_v54 }
 0x1d9   :  { %s346_s7 = spop %345 }
 0x1da   :  { %s348_s8 = spop %347 }
 0x1db   :  { %s288_s9 = sadd.f32 %s348_s8, %s346_s7  ;;  %s350_s10 = spop %349 }
 0x1dd   :  { %s289_s11 = smul.f32 0.5, %s288_s9 }
 0x1df   :  { %s298_s12 = smul.f32 %s350_s10, %s289_s11 }
 0x1e1   :  { %s299_s16 = smul.f32 16.0, %s298_s12 }
 0x1e3   :  { %300 = sst [smem:[#allocation4 + $0x2]] %s299_s16 }
 0x1e4   :  { %s301_s18 = sadd.f32 %s299_s16, %s193_s17 }
 0x1e6   :  { %302 = sst [smem:[#allocation4 + $0x3]] %s301_s18 }
 0x1e7   :  { %311 = dma.smem_to_vmem %s393_s19, 16, %s309_s15, [#allocation5]  }
 0x1e8   :  { %388 = dma.done.wait [#allocation5], 16  }
 0x1e9   :  { %389 = vsyncadd [#allocation5], 4294967280 }
 0x1ea   :  { %316 = sfence }
 0x1eb   :  { %317 = vsyncpa [#allocation5], 1 }

</bundles_post_ra>
